<compile_context>
chip_gen: v5e
topology: v5e:2x2
jax: 0.10.0
libtpu: 0.0.40
codegen_flags: <defaults>
</compile_context>

<pallas_src>
import jax
import jax.numpy as jnp
from jax.experimental import pallas as pl
from jax.experimental.pallas import tpu as pltpu

_MIB = 1024 * 1024


# ---------------------------------------------------------------------------
# Kernels
# ---------------------------------------------------------------------------

def _linear_kernel_fullk(x_ref, w_ref, b_ref, o_ref):
    """Full-K-resident path: one MXU dot per (i, j) tile, bias fused, no accumulator."""
    acc = jnp.dot(x_ref[...], w_ref[...], preferred_element_type=jnp.float32)
    o_ref[...] = (acc + b_ref[...].astype(jnp.float32)).astype(o_ref.dtype)


def _linear_kernel_ksplit_f32(x_ref, w_ref, b_ref, o_ref):
    """K-split path, f32 output: accumulate directly into the resident output tile.

    Bias is folded into the k == 0 init, so there is no extra bias pass on the last step.
    """
    @pl.when(pl.program_id(2) == 0)
    def _():
        o_ref[...] = jnp.broadcast_to(b_ref[...].astype(jnp.float32), o_ref.shape)

    o_ref[...] += jnp.dot(x_ref[...], w_ref[...], preferred_element_type=jnp.float32)


def _linear_kernel_ksplit_acc(x_ref, w_ref, b_ref, o_ref, acc_ref):
    """K-split path, narrow output (e.g. bf16): f32 VMEM accumulator, cast on last step."""
    k = pl.program_id(2)

    @pl.when(k == 0)
    def _():
        acc_ref[...] = jnp.broadcast_to(b_ref[...].astype(jnp.float32), acc_ref.shape)

    acc_ref[...] += jnp.dot(x_ref[...], w_ref[...], preferred_element_type=jnp.float32)

    @pl.when(k == pl.num_programs(2) - 1)
    def _():
        o_ref[...] = acc_ref[...].astype(o_ref.dtype)


# ---------------------------------------------------------------------------
# Wrapper / tile selection
# ---------------------------------------------------------------------------

def _round_up(x, m):
    return ((x + m - 1) // m) * m


def _vmem_capacity_bytes():
    """Per-generation VMEM capacity (128 MiB v5e/v6e, 64 MiB v7x); conservative fallback."""
    try:
        return int(pltpu.get_tpu_info().vmem_capacity_bytes)
    except Exception:
        return 64 * _MIB  # conservative: v7x per-TensorCore VMEM


def _tn_candidates(n, tn_max):
    """Descending N-tile candidates: full N first (no padding), then 128/256-multiples."""
    cands = []
    if n <= tn_max:
        cands.append(n)
    t = tn_max
    while t >= 128:
        if t < n:
            cands.append(t)
        t //= 2
    return cands or [n]


def _linear_2d(x, W, b, *, tm_max, tn_max, tk_max, interpret=False):
    M, K = x.shape
    K2, N = W.shape
    assert K == K2, f"inner dims mismatch: {K} vs {K2}"
    assert b.shape == (N,), f"bias shape {b.shape} != ({N},)"

    out_dtype = x.dtype
    in_sz = jnp.dtype(x.dtype).itemsize
    w_sz = jnp.dtype(W.dtype).itemsize
    b_sz = jnp.dtype(b.dtype).itemsize
    out_sz = jnp.dtype(out_dtype).itemsize
    needs_acc = jnp.dtype(out_dtype) != jnp.dtype(jnp.float32)

    # Generation-aware VMEM budget, leaving headroom for compiler internal scratch.
    vmem_cap = _vmem_capacity_bytes()
    budget = max(min(vmem_cap - 16 * _MIB, 112 * _MIB), 24 * _MIB)

    # Sub-32-bit dtypes pack along sublanes: keep the M tile a multiple of the pack.
    m_align = {1: 32, 2: 16}.get(in_sz, 8)
    if M <= tm_max:
        tm, Mp = M, M                      # full-dim block: no M padding
    else:
        tm = max((tm_max // m_align) * m_align, m_align)
        Mp = _round_up(M, tm)

    # Double-buffered footprint estimates (acc scratch is single-buffered, f32 only).
    def foot_fullk(tn_):
        return (2 * tm * K * in_sz + 2 * K * tn_ * w_sz
                + 2 * tm * tn_ * out_sz + 2 * tn_ * b_sz)

    def foot_ksplit(tn_, tk_):
        return (2 * tm * tk_ * in_sz + 2 * tk_ * tn_ * w_sz
                + 2 * tm * tn_ * out_sz + 2 * tn_ * b_sz
                + (tm * tn_ * 4 if needs_acc else 0))

    # Prefer keeping the full K resident (no reduction axis, no accumulator, no K pad).
    tn = None
    tk = K
    split_k = False
    for tn_c in _tn_candidates(N, tn_max):
        if foot_fullk(tn_c) <= budget:
            tn = tn_c
            break
    if tn is None:
        # K too large to hold resident: classic K-split with a resident accumulator.
        split_k = True
        tk = max((min(tk_max, K) // 256) * 256, 256) if K > tk_max else K
        for tn_c in _tn_candidates(N, tn_max):
            if foot_ksplit(tn_c, tk) <= budget:
                tn = tn_c
                break
        if tn is None:  # last-resort minimal tile; should not happen in practice
            tn = N if N <= 128 else 128

    Np = N if tn >= N else _round_up(N, tn)
    Kp = K if tk >= K else _round_up(K, tk)

    # Dual-TensorCore chips (v7x) shard "parallel" grid axes: avoid a 1-point grid.
    if (Mp // tm == 1) and (Np // tn == 1) and N >= 256 and N % 256 == 0:
        tn = N // 2
        Np = N

    footprint = foot_ksplit(tn, tk) if split_k else foot_fullk(tn)
    vmem_limit = int(min(max(2 * footprint, 32 * _MIB), budget))

    # Zero-pad only dimensions that are actually tiled below their full extent.
    if (Mp, Kp) != (M, K):
        x = jnp.pad(x, ((0, Mp - M), (0, Kp - K)))
    if (Kp, Np) != (K, N):
        W = jnp.pad(W, ((0, Kp - K), (0, Np - N)))
    if Np != N:
        b = jnp.pad(b, (0, Np - N))
    b2d = b.reshape(1, Np)

    cost = pl.CostEstimate(
        flops=2 * M * N * K,
        transcendentals=0,
        bytes_accessed=M * K * in_sz + K * N * w_sz + N * b_sz + M * N * out_sz,
    )

    if not split_k:
        grid = (Mp // tm, Np // tn)
        kernel = _linear_kernel_fullk
        in_specs = [
            pl.BlockSpec((tm, Kp), lambda i, j: (i, 0)),   # x tile (full K)
            pl.BlockSpec((Kp, tn), lambda i, j: (0, j)),   # W tile (full K)
            pl.BlockSpec((1, tn), lambda i, j: (0, j)),    # bias tile
        ]
        out_specs = pl.BlockSpec((tm, tn), lambda i, j: (i, j))
        scratch_shapes = []
        dim_sem = ("parallel", "parallel")
    else:
        grid = (Mp // tm, Np // tn, Kp // tk)
        kernel = _linear_kernel_ksplit_acc if needs_acc else _linear_kernel_ksplit_f32
        in_specs = [
            pl.BlockSpec((tm, tk), lambda i, j, k: (i, k)),   # x tile
            pl.BlockSpec((tk, tn), lambda i, j, k: (k, j)),   # W tile
            pl.BlockSpec((1, tn), lambda i, j, k: (0, j)),    # bias tile (k-independent)
        ]
        out_specs = pl.BlockSpec((tm, tn), lambda i, j, k: (i, j))
        scratch_shapes = [pltpu.VMEM((tm, tn), jnp.float32)] if needs_acc else []
        dim_sem = ("parallel", "parallel", "arbitrary")

    out_padded = pl.pallas_call(
        kernel,
        out_shape=jax.ShapeDtypeStruct((Mp, Np), out_dtype),
        grid_spec=pltpu.PrefetchScalarGridSpec(
            num_scalar_prefetch=0,
            grid=grid,
            in_specs=in_specs,
            out_specs=out_specs,
            scratch_shapes=scratch_shapes,
        ),
        compiler_params=pltpu.CompilerParams(
            dimension_semantics=dim_sem,
            vmem_limit_bytes=vmem_limit,
        ),
        cost_estimate=cost,
        interpret=interpret,
    )(x, W, b2d)

    if (Mp, Np) != (M, N):
        out_padded = out_padded[:M, :N]
    return out_padded


def linear(x, W, b, *, tm=512, tn=1024, tk=512, interpret=False):
    """out = x @ W + b (PyTorch `Linear.forward`). Leading dims of x are flattened,
    matching torch.matmul broadcasting over batch dimensions."""
    *lead, K = x.shape
    N = W.shape[1]
    out2 = _linear_2d(x.reshape(-1, K), W, b,
                      tm_max=tm, tn_max=tn, tk_max=tk, interpret=interpret)
    return out2.reshape(*lead, N)


def kaiming_init(key, shape, fan_in, dtype=jnp.float32):
    # Kaiming-normal-style init: N(0, sqrt(2 / fan_in)), deterministic via key.
    return (jax.random.normal(key, shape, dtype=jnp.float32)
            * jnp.sqrt(2.0 / fan_in)).astype(dtype)


if __name__ == "__main__":
    key = jax.random.PRNGKey(0)
    k1, k2, k3 = jax.random.split(key, 3)

    # Tolerances cover MXU default-precision (bf16-pass) differences between the
    # Pallas dot and the XLA reference matmul; structural bugs are far larger.
    TOL = dict(atol=2e-2, rtol=2e-2)

    # --- Case 1: MXU-friendly f32 shapes (full-K path; N split into two blocks so a
    #     "parallel" grid axis exists for dual-TensorCore chips) ---
    kx, kw, kb = jax.random.split(k1, 3)
    batch, in_f, out_f = 64, 128, 256
    x = jax.random.normal(kx, (batch, in_f), dtype=jnp.float32)
    W = kaiming_init(kw, (in_f, out_f), fan_in=in_f)
    b = kaiming_init(kb, (out_f,), fan_in=in_f)
    out = linear(x, W, b)
    jax.block_until_ready(out)
    ref = x @ W + b
    assert out.shape == ref.shape
    assert jnp.allclose(out, ref, **TOL), "mismatch vs reference (case 1)"

    # --- Case 2: odd, non-tile-aligned shapes (full-dim blocks, zero padding) ---
    kx, kw, kb = jax.random.split(k2, 3)
    M2, K2d, N2 = 100, 70, 130
    x2 = jax.random.normal(kx, (M2, K2d), dtype=jnp.float32)
    W2 = kaiming_init(kw, (K2d, N2), fan_in=K2d)
    b2 = kaiming_init(kb, (N2,), fan_in=K2d)
    out2 = linear(x2, W2, b2)
    jax.block_until_ready(out2)
    ref2 = x2 @ W2 + b2
    assert out2.shape == ref2.shape
    assert jnp.allclose(out2, ref2, **TOL), "mismatch vs reference (case 2)"

    # --- Case 3: bf16, batched input (leading dims flattened like torch.matmul) ---
    kx, kw, kb = jax.random.split(k3, 3)
    x3 = jax.random.normal(kx, (2, 8, 32), dtype=jnp.bfloat16)
    W3 = kaiming_init(kw, (32, 64), fan_in=32, dtype=jnp.bfloat16)
    b3 = kaiming_init(kb, (64,), fan_in=32, dtype=jnp.bfloat16)
    out3 = linear(x3, W3, b3)
    jax.block_until_ready(out3)
    ref3 = (x3.astype(jnp.float32) @ W3.astype(jnp.float32)
            + b3.astype(jnp.float32)).astype(jnp.bfloat16)
    assert out3.shape == ref3.shape
    assert jnp.allclose(out3.astype(jnp.float32), ref3.astype(jnp.float32),
                        atol=3e-2, rtol=3e-2), "mismatch vs reference (case 3, bf16)"

    print("KERNEL_OK")
</pallas_src>

<mosaic_0001>
module attributes {stable_mosaic.version = 11 : i64} {
  func.func @_linear_kernel_fullk(%arg0: i32, %arg1: i32, %arg2: memref<64x128xf32, #tpu.memory_space<vmem>>, %arg3: memref<128x128xf32, #tpu.memory_space<vmem>>, %arg4: memref<1x128xf32, #tpu.memory_space<vmem>>, %arg5: memref<64x128xf32, #tpu.memory_space<vmem>>) attributes {dimension_semantics = [#tpu.dimension_semantics<parallel>, #tpu.dimension_semantics<parallel>], iteration_bounds = array<i64: 1, 2>, scalar_prefetch = 0 : i64, scratch_operands = 0 : i64, tpu.core_type = #tpu.core_type<tc>, window_params = [{transform_indices = @transform_0, window_bounds = array<i64: 64, 128>}, {transform_indices = @transform_1, window_bounds = array<i64: 128, 128>}, {transform_indices = @transform_2, window_bounds = array<i64: 1, 128>}, {transform_indices = @transform_3, window_bounds = array<i64: 64, 128>}]} {
    %c0 = arith.constant 0 : index
    %c0_0 = arith.constant 0 : index
    %0 = vector.load %arg2[%c0, %c0_0] : memref<64x128xf32, #tpu.memory_space<vmem>>, vector<64x128xf32>
    %c0_1 = arith.constant 0 : index
    %c0_2 = arith.constant 0 : index
    %1 = vector.load %arg3[%c0_1, %c0_2] : memref<128x128xf32, #tpu.memory_space<vmem>>, vector<128x128xf32>
    %cst = arith.constant dense<0.000000e+00> : vector<64x128xf32>
    %2 = tpu.matmul %0, %1, %cst {dimension_numbers = #tpu.dot_dimension_numbers<[1], [0], [0], [1], [0, 0, 1, 1], [], []>} : vector<64x128xf32>, vector<128x128xf32>, vector<64x128xf32> -> vector<64x128xf32>
    %c0_3 = arith.constant 0 : index
    %c0_4 = arith.constant 0 : index
    %3 = vector.load %arg4[%c0_3, %c0_4] : memref<1x128xf32, #tpu.memory_space<vmem>>, vector<1x128xf32>
    %4 = vector.broadcast %3 : vector<1x128xf32> to vector<64x128xf32>
    %5 = arith.addf %2, %4 : vector<64x128xf32>
    %c0_5 = arith.constant 0 : index
    %c0_6 = arith.constant 0 : index
    %6 = vector.load %arg5[%c0_5, %c0_6] : memref<64x128xf32, #tpu.memory_space<vmem>>, vector<64x128xf32>
    tpu.vector_store %arg5[%c0_5, %c0_6], %5 {strides = array<i32>} : memref<64x128xf32, #tpu.memory_space<vmem>>, vector<64x128xf32>,
    return
  }
  func.func @transform_0(%arg0: i32, %arg1: i32) -> (i32, i32) {
    %c0_i32 = arith.constant 0 : i32
    %c0_i32_0 = arith.constant 0 : i32
    return %arg0, %c0_i32 : i32, i32
  }
  func.func @transform_1(%arg0: i32, %arg1: i32) -> (i32, i32) {
    %c0_i32 = arith.constant 0 : i32
    %c0_i32_0 = arith.constant 0 : i32
    return %c0_i32, %arg1 : i32, i32
  }
  func.func @transform_2(%arg0: i32, %arg1: i32) -> (i32, i32) {
    %c0_i32 = arith.constant 0 : i32
    %c0_i32_0 = arith.constant 0 : i32
    return %c0_i32, %arg1 : i32, i32
  }
  func.func @transform_3(%arg0: i32, %arg1: i32) -> (i32, i32) {
    %c0_i32 = arith.constant 0 : i32
    return %arg0, %arg1 : i32, i32
  }
}

</mosaic_0001>

<bundles_post_ra>
// kernel: tpu_custom_call.1
= control target key start
LH: loop header
LB: loop body
LE: loop exit
PB: predicated region body
PF: predicated region fallthrough
CT: control target
= control target key end

     0   :  { %8 = vsyncpa [#allocation3], 0  ;;  %s1024_s0 = inlined_call_operand.hbm [shape: f32[64,128], index: 0, kind: input, shape index: {}]   ;;  %s1025_s1 = inlined_call_operand.hbm [shape: f32[128,256], index: 1, kind: input, shape index: {}]   ;;  %s1026_s2 = inlined_call_operand.hbm [shape: f32[1,256], index: 2, kind: input, shape index: {}]   ;;  %s1027_s3 = inlined_call_operand.hbm [shape: f32[64,256], index: 3, kind: output, shape index: {}]  }
   0x1   :  { %9 = vsyncpa [#allocation6], 0 }
   0x2   :  { %11 = vsyncpa [#allocation6 + $0x1], 0 }
   0x3   :  { %12 = vsyncpa [#allocation4], 0 }
   0x4   :  { %14 = vsyncpa [#allocation4 + $0x1], 0  ;;  %s824_s12 = smov 0   ;;  %s826_s13 = smov 0  }
   0x5   :  { %s828_s14 = smov 0   ;;  %s830_s15 = smov 0  }
   0x6   :  { %s832_s16 = smov 0   ;;  %s834_s17 = smov 0  }
   0x7 LB: > { %s29_s18 = sadd.s32 1, %s791_s16  ;;  %s65_s19 = sadd.s32 1, %s783_s14  ;;  %s795_s17 = sphi %s834_s17, %s20_s17   ;;  %s791_s16 = sphi %s832_s16, %s1038_s16   ;;  %s787_s15 = sphi %s830_s15, %s1037_s15   ;;  %s783_s14 = sphi %s828_s14, %s1036_s14   ;;  %s779_s13 = sphi %s826_s13, %s1035_s13   ;;  %s775_s12 = sphi %s824_s12, %s1034_s12  }
   0x8   : > { %p30_p0 = scmp.ge.s32.totalorder %s29_s18, 2  ;;  %p72_p1 = scmp.ne.s32.totalorder %s783_s14, %s779_s13 }
   0x9   : > { %p73_p2 = scmp.eq.s32.totalorder %s795_s17, 0  ;;  %p475_p4 = scmp.ge.s32.totalorder %s795_s17, 2 }
   0xa   : > { %s1040_s18 = smov (%p30_p0, %s29_s18), 0  ;;  %p560_p6 = scmp.lt.s32.totalorder %s795_s17, 2 }
   0xb   : > { %p864_p3 = por %p73_p2, %p72_p1  ;;  %s62_s21 = ssub.s32 %s791_s16, %s1040_s18 }
   0xc   : > { %p63_p5 = scmp.eq.s32.totalorder %s62_s21, 0  ;;  %s173_s22 = sand.u32 1, %s795_s17  }
   0xd   : > { %s175_s23 = sand.u32 1, %s783_s14   ;;  %s477_s26 = sshll.u32 %s791_s16, 3 }
   0xe   : > { %s875_s24 = scalar_select %p63_p5, %s783_s14, %s65_s19  }
   0xf   : > { %s476_s25 = sshll.u32 %s175_s23, 7  ;;  %s181_s29 = scalar_lea.hbm %s1025_s1, %s477_s26 }
  0x10   : > { %s177_s30 = scalar_lea.vmem [#allocation5], %s476_s25  ;;  %s182_s5 = sshll.u32 %s181_s29, 4  ;;  %s183_s5 = int_to_ptr.hbm [resolvable:$true] %s182_s5 }
  0x11   : > { %s184_s4 = sshll.u32 %s177_s30, 4  ;;  %p885_p7 = pnand %p560_p6, %p864_p3  ;;  %s185_s4 = int_to_ptr.vmem [resolvable:$true] %s184_s4 }
  0x12   : > { %s889_s7 = scalar_lea.sflag [#allocation6], %s173_s22  ;;  %s797_s8 = smov 256  }
  0x13   : > { %s798_s9 = smov 128   ;;  %s799_s10 = smov 8  }
  0x14   : > { %551 = dma.hbm_to_vmem [thread:$0]  (!%p885_p7), %s183_s5, 2048, %s185_s4, %s889_s7, %s797_s8, %s798_s9, %s799_s10  }
  0x15   : > { %s897_s11 = sadd.s32 4294967295, %s795_s17   ;;  %s472_s19 = sadd.s32 4294967294, %s795_s17  }
  0x16   : > { %p78_p8 = scmp.ne.s32.totalorder %s779_s13, %s775_s12  ;;  %p79_p9 = scmp.eq.s32.totalorder %s897_s11, 0 }
  0x17   : > { %p130_p10 = scmp.eq.s32.totalorder %s897_s11, 1  ;;  %p136_p11 = scmp.eq.s32.totalorder %s472_s19, 1 }
  0x18   : > { %p906_p12 = por %p79_p9, %p78_p8  ;;  %p473_p13 = scmp.ge.s32.totalorder %s795_s17, 1 }
  0x19   : > { %p914_p0 = por %p130_p10, %p72_p1  ;;  %p918_p2 = por %p136_p11, %p78_p8 }
  0x1a   : > { %p143_p3 = scmp.lt.s32.totalorder %s795_s17, 3  ;;  %s157_s27 = sshll.u32 %s1024_s0, 4  ;;  %s158_s27 = int_to_ptr.hbm [resolvable:$true] %s157_s27 }
  0x1b   : > { %s800_s29 = smov [#allocation2]   ;;  %s200_s8 = scalar_lea.hbm %s1026_s2, %s791_s16 }
  0x1c   : > { %p926_p5 = pnand %p473_p13, %p143_p3  ;;  %s159_s30 = sshll.u32 %s800_s29, 4  ;;  %s160_s30 = int_to_ptr.vmem [resolvable:$true] %s159_s30 }
  0x1d   : > { %s197_s19 = scalar_lea.vmem [#allocation7], %s175_s23  ;;  %s202_s26 = sshll.u32 %s200_s8, 4  ;;  %s203_s26 = int_to_ptr.hbm [resolvable:$true] %s202_s26 }
  0x1e   : > { %p544_p1 = pneg %p926_p5  ;;  %s204_s25 = sshll.u32 %s197_s19, 4  ;;  %s205_s25 = int_to_ptr.vmem [resolvable:$true] %s204_s25 }
  0x1f   : > { %554 = dma.hbm_to_vmem [thread:$0]  (!%p885_p7), %s203_s26, 16, %s205_s25, %s889_s7  }
  0x20   : > { %p545_p6 = pnand %p544_p1, %p79_p9  ;;  %213 = sbr.rel (%p926_p5) target bundleno = 222 (0xde), region = 32 }
  0x22   : > { %547 = dma.hbm_to_vmem [thread:$0]  (!%p545_p6), %s158_s27, 1024, %s160_s30, [#allocation3], %s798_s9, %s798_s9, %s799_s10  }
  0x25   : > { %762 = dma.done.wait (%p79_p9), [#allocation3], 1024  }
  0x26   : > { %764 = vsyncadd (%p79_p9), [#allocation3], 4294966272  ;;  %s220_s23 = sand.u32 1, %s897_s11   ;;  %s954_s29 = sand.u32 1, %s779_s13  }
  0x27   : > { %s480_s4 = sshll.u32 %s954_s29, 7  ;;  %s221_s9 = scalar_lea.sflag [#allocation6], %s220_s23 }
  0x28   : > { %s957_s6 = scalar_lea.vmem [#allocation5], %s480_s4 }
  0x29   : > { %766 = dma.done.wait (%p906_p12), %s221_s9, 2064  }
  0x2a   : > { %768 = vsyncadd (%p906_p12), %s221_s9, 4294965232  ;;  %v286_v0 = vld [vmem:[%s957_s6 + $0x78] sm:$0xff]  ;;  %v285_v1 = vld [vmem:[%s957_s6 + $0x70] sm:$0xff]  ;;  %s233_s7 = scalar_lea.vmem [#allocation7], %s954_s29  ;;  %s481_s10 = sshll.u32 %s954_s29, 6 }
  0x2b   : > { %487 = vmatpush.msra.mxu2 %v286_v0  ;;  %488 = vmatpush.msra.mxu3 %v286_v0  ;;  %v284_v2 = vld [vmem:[%s957_s6 + $0x68] sm:$0xff]  ;;  %v283_v3 = vld [vmem:[%s957_s6 + $0x60] sm:$0xff]  ;;  %v282_v4 = vld [vmem:[%s957_s6 + $0x58] sm:$0xff]  ;;  %s260_s11 = scalar_lea.vmem [#allocation8], %s481_s10  ;;  %s483_s20 = sshll.u32 %s787_s15, 3 }
  0x2c   : > { %291 = vmatpush.msra.mxu0 %v286_v0  ;;  %486 = vmatpush.msra.mxu1 %v286_v0  ;;  %v281_v5 = vld [vmem:[%s957_s6 + $0x50] sm:$0xff]  ;;  %v280_v6 = vld [vmem:[%s957_s6 + $0x48] sm:$0xff]  ;;  %v279_v7 = vld [vmem:[%s957_s6 + $0x40] sm:$0xff]  ;;  %s354_s30 = scalar_lea.hbm %s1027_s3, %s483_s20  ;;  %s355_s5 = sshll.u32 %s260_s11, 4  ;;  %s987_s5 = int_to_ptr.vmem [resolvable:$true] %s355_s5 }
  0x2d   : > { %490 = vmatpush.msra.mxu2 %v285_v1  ;;  %491 = vmatpush.msra.mxu3 %v285_v1  ;;  %v278_v8 = vld [vmem:[%s957_s6 + $0x38] sm:$0xff]  ;;  %v277_v9 = vld [vmem:[%s957_s6 + $0x30] sm:$0xff]  ;;  %v276_v10 = vld [vmem:[%s957_s6 + $0x28] sm:$0xff]  ;;  %s357_s8 = sshll.u32 %s354_s30, 4  ;;  %s341_s15 = scalar_lea.sflag [#allocation4], %s954_s29  ;;  %s358_s8 = int_to_ptr.hbm [resolvable:$true] %s357_s8 }
  0x2e   : > { %292 = vmatpush.msra.mxu0 %v285_v1  ;;  %489 = vmatpush.msra.mxu1 %v285_v1  ;;  %v275_v11 = vld [vmem:[%s957_s6 + $0x20] sm:$0xff]  ;;  %v274_v12 = vld [vmem:[%s957_s6 + $0x18] sm:$0xff]  ;;  %v273_v13 = vld [vmem:[%s957_s6 + $0x10] sm:$0xff]  ;;  %s723_s19 = sshra.s32 %s358_s8, 4  ;;  %s729_s4 = scalar_lea.hbm %s1027_s3, 128  ;;  %s724_s19 = int_to_ptr.hbm [resolvable:$true] %s723_s19 }
  0x2f   : > { %493 = vmatpush.msra.mxu2 %v284_v2  ;;  %494 = vmatpush.msra.mxu3 %v284_v2  ;;  %v272_v14 = vld [vmem:[%s957_s6 + $0x8] sm:$0xff]  ;;  %v271_v15 = vld [vmem:[%s957_s6] sm:$0xff]  ;;  %v269_v17 = vld [vmem:[#allocation2 + $0x30] sm:$0xff]  ;;  %s725_s25 = scalar_lea.hbm %s724_s19, 64  ;;  %p730_p10 = scmp.lt.s32.totalorder %s724_s19, %s1027_s3 }
  0x30   : > { %293 = vmatpush.msra.mxu0 %v284_v2  ;;  %492 = vmatpush.msra.mxu1 %v284_v2  ;;  %v267_v16 = vld [vmem:[#allocation2 + $0x20] sm:$0xff]  ;;  %v265_v19 = vld [vmem:[#allocation2 + $0x10] sm:$0xff]  ;;  %v268_v20 = vld [vmem:[#allocation2 + $0x28] sm:$0xff]  ;;  %p726_p7 = scmp.ne.s32.totalorder %s724_s19, %s725_s25  ;;  %p731_p11 = scmp.lt.s32.totalorder %s729_s4, %s725_s25 }
  0x31   : > { %496 = vmatpush.msra.mxu2 %v283_v3  ;;  %497 = vmatpush.msra.mxu3 %v283_v3  ;;  %v263_v18 = vld [vmem:[#allocation2] sm:$0xff]  ;;  %v270_v21 = vld [vmem:[#allocation2 + $0x38] sm:$0xff]  ;;  %v264_v22 = vld [vmem:[#allocation2 + $0x8] sm:$0xff] }
  0x32   : > { %294 = vmatpush.msra.mxu0 %v283_v3  ;;  %495 = vmatpush.msra.mxu1 %v283_v3  ;;  %v266_v23 = vld [vmem:[#allocation2 + $0x18] sm:$0xff]  ;;  %v618_v24 = vld [vmem:[%s233_s7] ss:$0 sm:$0xff]  ;;  %p727_p8 = pnand %p726_p7, %p914_p0  ;;  %p732_p12 = por %p731_p11, %p730_p10 }
  0x33   : > { %499 = vmatpush.msra.mxu2 %v282_v4  ;;  %500 = vmatpush.msra.mxu3 %v282_v4 }
  0x34   : > { %295 = vmatpush.msra.mxu0 %v282_v4  ;;  %498 = vmatpush.msra.mxu1 %v282_v4  ;;  %p728_p9 = pneg %p727_p8 }
  0x35   : > { %502 = vmatpush.msra.mxu2 %v281_v5  ;;  %503 = vmatpush.msra.mxu3 %v281_v5 }
  0x36   : > { %296 = vmatpush.msra.mxu0 %v281_v5  ;;  %501 = vmatpush.msra.mxu1 %v281_v5  ;;  %p733_p13 = pnand %p732_p12, %p728_p9 }
  0x37   : > { %505 = vmatpush.msra.mxu2 %v280_v6  ;;  %506 = vmatpush.msra.mxu3 %v280_v6 }
  0x38   : > { %297 = vmatpush.msra.mxu0 %v280_v6  ;;  %504 = vmatpush.msra.mxu1 %v280_v6 }
  0x39   : > { %508 = vmatpush.msra.mxu2 %v279_v7  ;;  %509 = vmatpush.msra.mxu3 %v279_v7 }
  0x3a   : > { %298 = vmatpush.msra.mxu0 %v279_v7  ;;  %507 = vmatpush.msra.mxu1 %v279_v7 }
  0x3b   : > { %511 = vmatpush.msra.mxu2 %v278_v8  ;;  %512 = vmatpush.msra.mxu3 %v278_v8 }
  0x3c   : > { %299 = vmatpush.msra.mxu0 %v278_v8  ;;  %510 = vmatpush.msra.mxu1 %v278_v8 }
  0x3d   : > { %514 = vmatpush.msra.mxu2 %v277_v9  ;;  %515 = vmatpush.msra.mxu3 %v277_v9 }
  0x3e   : > { %300 = vmatpush.msra.mxu0 %v277_v9  ;;  %513 = vmatpush.msra.mxu1 %v277_v9 }
  0x3f   : > { %517 = vmatpush.msra.mxu2 %v276_v10  ;;  %518 = vmatpush.msra.mxu3 %v276_v10 }
  0x40   : > { %301 = vmatpush.msra.mxu0 %v276_v10  ;;  %516 = vmatpush.msra.mxu1 %v276_v10 }
  0x41   : > { %520 = vmatpush.msra.mxu2 %v275_v11  ;;  %521 = vmatpush.msra.mxu3 %v275_v11 }
  0x42   : > { %302 = vmatpush.msra.mxu0 %v275_v11  ;;  %519 = vmatpush.msra.mxu1 %v275_v11 }
  0x43   : > { %523 = vmatpush.msra.mxu2 %v274_v12  ;;  %524 = vmatpush.msra.mxu3 %v274_v12 }
  0x44   : > { %303 = vmatpush.msra.mxu0 %v274_v12  ;;  %522 = vmatpush.msra.mxu1 %v274_v12 }
  0x45   : > { %526 = vmatpush.msra.mxu2 %v273_v13  ;;  %527 = vmatpush.msra.mxu3 %v273_v13 }
  0x46   : > { %304 = vmatpush.msra.mxu0 %v273_v13  ;;  %525 = vmatpush.msra.mxu1 %v273_v13 }
  0x47   : > { %529 = vmatpush.msra.mxu2 %v272_v14  ;;  %530 = vmatpush.msra.mxu3 %v272_v14 }
  0x48   : > { %305 = vmatpush.msra.mxu0 %v272_v14  ;;  %528 = vmatpush.msra.mxu1 %v272_v14 }
  0x49   : > { %532 = vmatpush.msra.mxu2 %v271_v15  ;;  %533 = vmatpush.msra.mxu3 %v271_v15 }
  0x4a   : > { %319 = vmatmul.f32.vlgmr.msra.gmra.mxu2 %v267_v16  ;;  %325 = vmatmul.f32.vlgmr.msra.gmra.mxu3 %v269_v17 }
  0x4b   : > { %306 = vmatpush.msra.mxu0 %v271_v15  ;;  %531 = vmatpush.msra.mxu1 %v271_v15 }
  0x4c   : > { %307 = vmatmul.f32.vlgmr.msra.gmra.mxu0 %v263_v18  ;;  %313 = vmatmul.f32.vlgmr.msra.gmra.mxu1 %v265_v19 }
  0x52   : > { %322 = vmatmul.f32.gmra.mxu2 %v268_v20  ;;  %328 = vmatmul.f32.gmra.mxu3 %v270_v21 }
  0x54   : > { %310 = vmatmul.f32.gmra.mxu0 %v264_v22  ;;  %316 = vmatmul.f32.gmra.mxu1 %v266_v23 }
  0xc9   : > { %v308_v25 = vpop.f32.mrf.mxu0  ;;  %v314_v26 = vpop.f32.mrf.mxu1 }
  0xca   : > { %v309_v27 = vadd.f32 %v618_v24, %v308_v25  ;;  %v315_v28 = vadd.f32 %v618_v24, %v314_v26 }
  0xcc   : > { %332 = vst [vmem:[%s260_s11] sm:$0xff] %v309_v27 }
  0xcd   : > { %334 = vst [vmem:[%s260_s11 + $0x10] sm:$0xff] %v315_v28  ;;  %v320_v29 = vpop.f32.mrf.mxu2  ;;  %v326_v30 = vpop.f32.mrf.mxu3 }
  0xce   : > { %v321_v31 = vadd.f32 %v618_v24, %v320_v29  ;;  %v327_v32 = vadd.f32 %v618_v24, %v326_v30 }
  0xd0   : > { %336 = vst [vmem:[%s260_s11 + $0x20] sm:$0xff] %v321_v31 }
  0xd1   : > { %338 = vst [vmem:[%s260_s11 + $0x30] sm:$0xff] %v327_v32  ;;  %v311_v33 = vpop.f32.mrf.mxu0  ;;  %v317_v34 = vpop.f32.mrf.mxu1 }
  0xd2   : > { %v312_v35 = vadd.f32 %v618_v24, %v311_v33  ;;  %v318_v36 = vadd.f32 %v618_v24, %v317_v34 }
  0xd4   : > { %333 = vst [vmem:[%s260_s11 + $0x8] sm:$0xff] %v312_v35 }
  0xd5   : > { %335 = vst [vmem:[%s260_s11 + $0x18] sm:$0xff] %v318_v36  ;;  %v323_v37 = vpop.f32.mrf.mxu2  ;;  %v329_v38 = vpop.f32.mrf.mxu3 }
  0xd6   : > { %v324_v39 = vadd.f32 %v618_v24, %v323_v37  ;;  %v330_v40 = vadd.f32 %v618_v24, %v329_v38 }
  0xd8   : > { %337 = vst [vmem:[%s260_s11 + $0x28] sm:$0xff] %v324_v39 }
  0xd9   : > { %339 = vst [vmem:[%s260_s11 + $0x38] sm:$0xff] %v330_v40 }
  0xda   : > { %736 = shalt.err (!%p733_p13)
}
  0xdb   : > { %s801_s29 = smov 128   ;;  %s802_s7 = smov 256  }
  0xdc   : > { %s803_s10 = smov 8  }
  0xdd   : > { %542 = dma.vmem_to_hbm [thread:$0]  (%p914_p0), %s987_s5, 1024, %s358_s8, %s341_s15, %s801_s29, %s802_s7, %s803_s10  }
  0xde PF: > { %s372_s11 = sand.u32 1, %s775_s12   ;;  %p556_p3 = pnand %p475_p4, %p918_p2 }
  0xdf   : > { %s373_s20 = scalar_lea.sflag [#allocation4], %s372_s11 }
  0xe0   : > { %p557_p5 = pneg %p556_p3 }
  0xe2   : > { %770 = dma.done.wait (%p557_p5), %s373_s20, 1024  }
  0xe3   : > { %772 = vsyncadd (%p557_p5), %s373_s20, 4294966272  ;;  %s20_s17 = sadd.s32 1, %s795_s17   ;;  %s1034_s12 = smov %s779_s13 }
  0xe4   : > { %p17_p1 = scmp.ge.s32.totalorder %s20_s17, 4   ;;  %s1035_s13 = smov %s783_s14 }
  0xe5   : > { %s1036_s14 = smov %s875_s24  ;;  %s1037_s15 = smov %s791_s16 }
  0xe6   : > { %s1038_s16 = smov %s1040_s18  ;;  %19 = sbr.rel (!%p17_p1) target bundleno = 7 (0x7), region = 94 }
  0xeb   :  { %379 = vsyncpa [#allocation3], 1 }
  0xec   :  { %381 = vsyncpa [#allocation3 + $0x1], 1 }
  0xed   :  { %382 = vsyncpa [#allocation6], 1 }
  0xee   :  { %384 = vsyncpa [#allocation6 + $0x1], 1 }
  0xef   :  { %385 = vsyncpa [#allocation4], 1 }
  0xf0   :  { %387 = vsyncpa [#allocation4 + $0x1], 1 }

</bundles_post_ra>
